<compile_context>
chip_gen: v5e
topology: v5e:2x2
jax: 0.10.0
libtpu: 0.0.40
codegen_flags: <defaults>
</compile_context>

<pallas_src>
import math

import jax
import jax.numpy as jnp
from jax.experimental import pallas as pl
from jax.experimental.pallas import tpu as pltpu


def _copy_kernel(x_ref, o_ref):
    # Pure streaming copy of a lane-dense (TB, TN) tile — HBM-bandwidth bound.
    o_ref[...] = x_ref[...]


_SUBLANE = {4: 8, 2: 16, 1: 32}  # minimum sublane multiple per itemsize


def _choose_tiles(b, n, itemsize, budget):
    """Pick a (TB, TN) tile of the flattened (b, n) array.

    TB is a multiple of the dtype's sublane packing (or the full b when b is
    small); TN is the full n or a multiple of 128.  Tile bytes are kept at or
    below `budget` so that in+out double buffers fit comfortably in scoped
    VMEM on every TPU generation.
    """
    sub = _SUBLANE.get(itemsize, 8)

    # Lane (last) dim: full n unless it is 128-divisible and too large.
    if n % 128 == 0 and n * sub * itemsize > budget:
        tn = max(128, (budget // (sub * itemsize)) // 128 * 128)
        tn = min(tn, n)
    else:
        tn = n  # full array dim is always a legal block dim

    # Sublane (row) dim.
    if b <= sub:
        tb = b  # full array dim
    else:
        row_bytes = tn * itemsize
        max_tb = max(sub, (budget // max(row_bytes, 1)) // sub * sub)
        tb = min((b // sub) * sub, max_tb)

    return tb, tn


def flatten(x, insize, *, tile_budget_bytes=4 * 1024 * 1024):
    """Pallas equivalent of Flatten(insize).forward(x).

    insize: [C, W] (3D input) or [C, H, W] (4D input).
    Returns an array of shape (B, prod(insize)).
    """
    insize = [int(s) for s in insize]
    if len(insize) not in (2, 3):
        raise TypeError('Input size list must have 2 or 3 elements.')
    for s in insize:
        if s < 1:
            raise ValueError('Input size must be > 0.')

    n = math.prod(insize)
    total = int(x.size)
    assert total % n == 0, "input size inconsistent with insize"
    b = total // n  # mirrors torch's view(-1, n): leading dim is inferred

    # Metadata-only reshape in the wrapper (free for XLA).  The kernel then
    # sees a lane-dense (b, n) slab on both input and output.
    x2 = jnp.reshape(x, (b, n))

    itemsize = jnp.dtype(x2.dtype).itemsize
    tb, tn = _choose_tiles(b, n, itemsize, tile_budget_bytes)
    grid = (pl.cdiv(b, tb), pl.cdiv(n, tn))

    return pl.pallas_call(
        _copy_kernel,
        out_shape=jax.ShapeDtypeStruct((b, n), x2.dtype),
        grid_spec=pltpu.PrefetchScalarGridSpec(
            num_scalar_prefetch=0,
            grid=grid,
            in_specs=[pl.BlockSpec((tb, tn), lambda i, j: (i, j))],
            out_specs=pl.BlockSpec((tb, tn), lambda i, j: (i, j)),
        ),
        compiler_params=pltpu.CompilerParams(
            dimension_semantics=("parallel", "parallel"),
            vmem_limit_bytes=32 * 1024 * 1024,
        ),
    )(x2)


if __name__ == "__main__":
    key = jax.random.PRNGKey(0)

    # 4D case: [B, C, H, W] -> [B, C*H*W]   (single fat block, grid (1, 1))
    B, C, H, W = 2, 4, 16, 16
    x4 = jax.random.normal(key, (B, C, H, W), dtype=jnp.float32)
    out4 = jax.block_until_ready(flatten(x4, [C, H, W]))
    ref4 = jnp.reshape(x4, (B, C * H * W))
    assert out4.shape == (B, C * H * W)
    assert out4.dtype == x4.dtype
    assert jnp.array_equal(out4, ref4)

    # 3D case: [B, C, W] -> [B, C*W]
    key2 = jax.random.PRNGKey(1)
    B3, C3, W3 = 2, 4, 32
    x3 = jax.random.normal(key2, (B3, C3, W3), dtype=jnp.float32)
    out3 = jax.block_until_ready(flatten(x3, [C3, W3]))
    ref3 = jnp.reshape(x3, (B3, C3 * W3))
    assert out3.shape == (B3, C3 * W3)
    assert jnp.array_equal(out3, ref3)

    # Row-tiled path (small budget forces grid > 1 along rows).
    key3 = jax.random.PRNGKey(2)
    Bb, Cb, Hb, Wb = 24, 4, 16, 16
    xb = jax.random.normal(key3, (Bb, Cb, Hb, Wb), dtype=jnp.float32)
    outb = jax.block_until_ready(
        flatten(xb, [Cb, Hb, Wb], tile_budget_bytes=32 * 1024))
    refb = jnp.reshape(xb, (Bb, Cb * Hb * Wb))
    assert jnp.array_equal(outb, refb)

    # Ragged rows + tiled lane dim (B not a multiple of 8, N split into 128k
    # chunks) to exercise boundary-block handling.
    key4 = jax.random.PRNGKey(3)
    Br, Cr, Hr, Wr = 10, 4, 16, 16
    xr = jax.random.normal(key4, (Br, Cr, Hr, Wr), dtype=jnp.float32)
    outr = jax.block_until_ready(
        flatten(xr, [Cr, Hr, Wr], tile_budget_bytes=16 * 1024))
    refr = jnp.reshape(xr, (Br, Cr * Hr * Wr))
    assert jnp.array_equal(outr, refr)

    print("KERNEL_OK")
</pallas_src>

<mosaic_0001>
module attributes {stable_mosaic.version = 11 : i64} {
  func.func @_copy_kernel(%arg0: i32, %arg1: i32, %arg2: memref<2x1024xf32, #tpu.memory_space<vmem>>, %arg3: memref<2x1024xf32, #tpu.memory_space<vmem>>) attributes {dimension_semantics = [#tpu.dimension_semantics<parallel>, #tpu.dimension_semantics<parallel>], iteration_bounds = array<i64: 1, 1>, scalar_prefetch = 0 : i64, scratch_operands = 0 : i64, tpu.core_type = #tpu.core_type<tc>, window_params = [{transform_indices = @transform_0, window_bounds = array<i64: 2, 1024>}, {transform_indices = @transform_1, window_bounds = array<i64: 2, 1024>}]} {
    %c0 = arith.constant 0 : index
    %c0_0 = arith.constant 0 : index
    %0 = vector.load %arg2[%c0, %c0_0] : memref<2x1024xf32, #tpu.memory_space<vmem>>, vector<2x1024xf32>
    %c0_1 = arith.constant 0 : index
    %c0_2 = arith.constant 0 : index
    %1 = vector.load %arg3[%c0_1, %c0_2] : memref<2x1024xf32, #tpu.memory_space<vmem>>, vector<2x1024xf32>
    tpu.vector_store %arg3[%c0_1, %c0_2], %0 {strides = array<i32>} : memref<2x1024xf32, #tpu.memory_space<vmem>>, vector<2x1024xf32>,
    return
  }
  func.func @transform_0(%arg0: i32, %arg1: i32) -> (i32, i32) {
    %c0_i32 = arith.constant 0 : i32
    return %arg0, %arg1 : i32, i32
  }
  func.func @transform_1(%arg0: i32, %arg1: i32) -> (i32, i32) {
    %c0_i32 = arith.constant 0 : i32
    return %arg0, %arg1 : i32, i32
  }
}

</mosaic_0001>

<bundles_post_ra>
// kernel: tpu_custom_call.1
= control target key start
LH: loop header
LB: loop body
LE: loop exit
PB: predicated region body
PF: predicated region fallthrough
CT: control target
= control target key end

     0   :  { %6 = vsyncpa [#allocation3], 0  ;;  %s116_s0 = inlined_call_operand.hbm [shape: f32[2,1024], index: 0, kind: input, shape index: {}]   ;;  %s117_s1 = inlined_call_operand.hbm [shape: f32[2,1024], index: 1, kind: output, shape index: {}]  }
   0x1   :  { %7 = vsyncpa [#allocation4], 0  ;;  %s13_s8 = sshll.u32 %s116_s0, 4  ;;  %s98_s9 = smov [#allocation2]   ;;  %s14_s8 = int_to_ptr.hbm [resolvable:$true] %s13_s8 }
   0x2   :  { %s15_s10 = sshll.u32 %s98_s9, 4  ;;  %s16_s10 = int_to_ptr.vmem [resolvable:$true] %s15_s10 }
   0x3   :  { %18 = dma.hbm_to_vmem [thread:$0]  %s14_s8, 256, %s16_s10, [#allocation3]  }
   0x4   :  { %94 = dma.done.wait [#allocation3], 256  }
   0x5   :  { %95 = vsyncadd [#allocation3], 4294967040  ;;  %s99_s11 = smov [#allocation5]   ;;  %s34_s15 = sshll.u32 %s117_s1, 4  ;;  %v23_v0 = vld [vmem:[#allocation2] sm:$0xff]  ;;  %v24_v1 = vld [vmem:[#allocation2 + $0x8] sm:$0xff]  ;;  %s35_s15 = int_to_ptr.hbm [resolvable:$true] %s34_s15 }
   0x6   :  { %s32_s12 = sshll.u32 %s99_s11, 4  ;;  %25 = vst [vmem:[#allocation5] sm:$0xff] %v23_v0  ;;  %s33_s12 = int_to_ptr.vmem [resolvable:$true] %s32_s12 }
   0x7   :  { %26 = vst [vmem:[#allocation5 + $0x8] sm:$0xff] %v24_v1 }
   0x8   :  { %37 = dma.vmem_to_hbm [thread:$0]  %s33_s12, 256, %s35_s15, [#allocation4]  }
   0x9   :  { %96 = dma.done.wait [#allocation4], 256  }
   0xa   :  { %97 = vsyncadd [#allocation4], 4294967040 }
   0xb   :  { %42 = vsyncpa [#allocation3], 1 }
   0xc   :  { %43 = vsyncpa [#allocation4], 1 }

</bundles_post_ra>
